<compile_context>
chip_gen: v7x
topology: tpu7x:2x2x1
jax: 0.10.0
libtpu: 0.0.40
codegen_flags: <defaults>
</compile_context>

<pallas_src>
import jax
import jax.numpy as jnp
from jax.experimental import pallas as pl
from jax.experimental.pallas import tpu as pltpu

_LANE = 128  # TPU lane width


def _round_up(x, m):
    return (x + m - 1) // m * m


def _mlp_kernel(x_ref, w1_ref, b1_ref, w2_ref, b2_ref, w3_ref, b3_ref, o_ref):
    nc = o_ref.shape[-1]
    # Cast the f32 x tile to bf16 in-kernel (MXU-native, no wrapper pass over x).
    x = x_ref[...].astype(jnp.bfloat16)
    # fc1 + ReLU : bf16 MXU matmul, f32 accumulate + f32 epilogue.
    h1 = jnp.dot(x, w1_ref[...], preferred_element_type=jnp.float32)
    h1 = jnp.maximum(h1 + b1_ref[...], 0.0)
    # fc2 + ReLU
    h2 = jnp.dot(h1.astype(w2_ref.dtype), w2_ref[...],
                 preferred_element_type=jnp.float32)
    h2 = jnp.maximum(h2 + b2_ref[...], 0.0)
    # fc3 (lane-padded for the MXU) + Sigmoid; slice padded lanes before the store
    # so only (tb, num_classes) f32 goes back to HBM.
    logits = jnp.dot(h2.astype(w3_ref.dtype), w3_ref[...],
                     preferred_element_type=jnp.float32) + b3_ref[...]
    o_ref[...] = jax.nn.sigmoid(logits[:, :nc]).astype(o_ref.dtype)


def ecg_classifier_forward(x, params, *, block_b=4096):
    """x: (B, input_dim) float32.  params: (in,out) weights, (1,out) biases (f32)."""
    w1, b1, w2, b2, w3, b3 = (params["w1"], params["b1"], params["w2"],
                              params["b2"], params["w3"], params["b3"])
    B, D = x.shape
    num_classes = w3.shape[1]

    # fc3 weights/bias padded to a full 128-lane width for the MXU (tiny + resident).
    nc_pad = _round_up(num_classes, _LANE)
    w3p = jnp.zeros((w3.shape[0], nc_pad), w3.dtype).at[:, :num_classes].set(w3)
    b3p = jnp.zeros((1, nc_pad), b3.dtype).at[:, :num_classes].set(b3)

    # bf16 weights on the MXU, f32 biases / epilogue.
    w1_bf = w1.astype(jnp.bfloat16)
    w2_bf = w2.astype(jnp.bfloat16)
    w3_bf = w3p.astype(jnp.bfloat16)
    b1_f = b1.astype(jnp.float32)
    b2_f = b2.astype(jnp.float32)
    b3_f = b3p.astype(jnp.float32)

    # Batch tile: large (amortize per-step overhead), multiple of 8, and capped at
    # ~ceil(B/2) so there are >=2 grid tiles for v7x's two TensorCores.
    tb = min(block_b, _round_up(pl.cdiv(B, 2), 8), _round_up(B, 8))
    tb = max(tb, 8)
    grid = (pl.cdiv(B, tb),)  # ragged last tile handled by Pallas boundary clipping

    def resident(shape):
        # Constant block index -> stays in VMEM across the whole batch grid;
        # single-buffered to free a little VMEM headroom.
        return pl.BlockSpec(shape, lambda i: (0, 0), pipeline_mode=pl.Buffered(1))

    flops = 2 * B * (D * 128 + 128 * 64 + 64 * nc_pad)
    bytes_accessed = (B * D * 4                      # x (f32 in)
                      + B * num_classes * 4          # out (f32)
                      + 2 * (w1_bf.size + w2_bf.size + w3_bf.size)
                      + 4 * (b1_f.size + b2_f.size + b3_f.size))
    cost = pl.CostEstimate(flops=int(flops),
                           transcendentals=int(B * num_classes),
                           bytes_accessed=int(bytes_accessed))

    out = pl.pallas_call(
        _mlp_kernel,
        out_shape=jax.ShapeDtypeStruct((B, num_classes), jnp.float32),
        grid=grid,
        in_specs=[
            pl.BlockSpec((tb, D), lambda i: (i, 0)),        # x: streamed over batch
            resident(w1_bf.shape), resident(b1_f.shape),    # weights/biases: resident
            resident(w2_bf.shape), resident(b2_f.shape),
            resident(w3_bf.shape), resident(b3_f.shape),
        ],
        out_specs=pl.BlockSpec((tb, num_classes), lambda i: (i, 0)),
        compiler_params=pltpu.CompilerParams(
            dimension_semantics=("parallel",)),
        cost_estimate=cost,
    )(x, w1_bf, b1_f, w2_bf, b2_f, w3_bf, b3_f)

    return out


def init_params(key, input_dim, num_classes):
    """Deterministic init mimicking nn.Linear's U(-1/sqrt(fan_in), 1/sqrt(fan_in))."""
    def linear(k, fan_in, fan_out):
        kw, kb = jax.random.split(k)
        bound = 1.0 / jnp.sqrt(fan_in)
        w = jax.random.uniform(kw, (fan_in, fan_out), jnp.float32, -bound, bound)
        b = jax.random.uniform(kb, (1, fan_out), jnp.float32, -bound, bound)
        return w, b

    k1, k2, k3 = jax.random.split(key, 3)
    w1, b1 = linear(k1, input_dim, 128)
    w2, b2 = linear(k2, 128, 64)
    w3, b3 = linear(k3, 64, num_classes)
    return {"w1": w1, "b1": b1, "w2": w2, "b2": b2, "w3": w3, "b3": b3}


def _reference(x, p):
    """Pure-JAX reference mimicking the kernel's bf16 cast points, f32 math."""
    # TODO(synk): kernel uses bf16 MXU inputs (f32 accumulate); exact f32 parity with
    # the PyTorch module would need precision="highest" f32 matmuls in the kernel.
    f32 = jnp.float32
    bf = lambda a: a.astype(jnp.bfloat16).astype(f32)
    xq, w1, w2, w3 = bf(x), bf(p["w1"]), bf(p["w2"]), bf(p["w3"])
    h1 = jnp.maximum(jnp.dot(xq, w1, precision="highest") + p["b1"], 0.0)
    h2 = jnp.maximum(jnp.dot(bf(h1), w2, precision="highest") + p["b2"], 0.0)
    return jax.nn.sigmoid(jnp.dot(bf(h2), w3, precision="highest") + p["b3"])


if __name__ == "__main__":
    key = jax.random.PRNGKey(0)
    k_params, k_x = jax.random.split(key)

    batch, input_dim, num_classes = 16, 32, 4   # 2 grid tiles at tb=8
    params = init_params(k_params, input_dim, num_classes)
    x = jax.random.normal(k_x, (batch, input_dim), dtype=jnp.float32)

    out = ecg_classifier_forward(x, params)
    out = jax.block_until_ready(out)

    ref = _reference(x, params)
    assert out.shape == (batch, num_classes)
    assert jnp.allclose(out, ref, atol=1e-2, rtol=1e-2)

    print("KERNEL_OK")
</pallas_src>

<mosaic_0001>
module attributes {stable_mosaic.version = 11 : i64} {
  func.func @_mlp_kernel(%arg0: i32, %arg1: memref<8x32xf32, #tpu.memory_space<vmem>>, %arg2: memref<32x128xbf16, #tpu.memory_space<vmem>>, %arg3: memref<1x128xf32, #tpu.memory_space<vmem>>, %arg4: memref<128x64xbf16, #tpu.memory_space<vmem>>, %arg5: memref<1x64xf32, #tpu.memory_space<vmem>>, %arg6: memref<64x128xbf16, #tpu.memory_space<vmem>>, %arg7: memref<1x128xf32, #tpu.memory_space<vmem>>, %arg8: memref<8x4xf32, #tpu.memory_space<vmem>>) attributes {dimension_semantics = [#tpu.dimension_semantics<parallel>], iteration_bounds = array<i64: 2>, scalar_prefetch = 0 : i64, scratch_operands = 0 : i64, tpu.core_type = #tpu.core_type<tc>, window_params = [{transform_indices = @transform_0, window_bounds = array<i64: 8, 32>}, {pipeline_mode = #tpu.pipeline_mode<synchronous>, transform_indices = @transform_1, window_bounds = array<i64: 32, 128>}, {pipeline_mode = #tpu.pipeline_mode<synchronous>, transform_indices = @transform_2, window_bounds = array<i64: 1, 128>}, {pipeline_mode = #tpu.pipeline_mode<synchronous>, transform_indices = @transform_3, window_bounds = array<i64: 128, 64>}, {pipeline_mode = #tpu.pipeline_mode<synchronous>, transform_indices = @transform_4, window_bounds = array<i64: 1, 64>}, {pipeline_mode = #tpu.pipeline_mode<synchronous>, transform_indices = @transform_5, window_bounds = array<i64: 64, 128>}, {pipeline_mode = #tpu.pipeline_mode<synchronous>, transform_indices = @transform_6, window_bounds = array<i64: 1, 128>}, {transform_indices = @transform_7, window_bounds = array<i64: 8, 4>}]} {
    %c0 = arith.constant 0 : index
    %c0_0 = arith.constant 0 : index
    %0 = vector.load %arg1[%c0, %c0_0] : memref<8x32xf32, #tpu.memory_space<vmem>>, vector<8x32xf32>
    %1 = arith.truncf %0 : vector<8x32xf32> to vector<8x32xbf16>
    %c0_1 = arith.constant 0 : index
    %c0_2 = arith.constant 0 : index
    %2 = vector.load %arg2[%c0_1, %c0_2] : memref<32x128xbf16, #tpu.memory_space<vmem>>, vector<32x128xbf16>
    %cst = arith.constant dense<0.000000e+00> : vector<8x128xf32>
    %3 = tpu.matmul %1, %2, %cst {dimension_numbers = #tpu.dot_dimension_numbers<[1], [0], [0], [1], [0, 0, 1, 1], [], []>} : vector<8x32xbf16>, vector<32x128xbf16>, vector<8x128xf32> -> vector<8x128xf32>
    %c0_3 = arith.constant 0 : index
    %c0_4 = arith.constant 0 : index
    %4 = vector.load %arg3[%c0_3, %c0_4] : memref<1x128xf32, #tpu.memory_space<vmem>>, vector<1x128xf32>
    %5 = vector.broadcast %4 : vector<1x128xf32> to vector<8x128xf32>
    %6 = arith.addf %3, %5 : vector<8x128xf32>
    %cst_5 = arith.constant 0.000000e+00 : f32
    %7 = vector.broadcast %cst_5 : f32 to vector<8x128xf32>
    %8 = arith.maximumf %6, %7 : vector<8x128xf32>
    %9 = arith.truncf %8 : vector<8x128xf32> to vector<8x128xbf16>
    %c0_6 = arith.constant 0 : index
    %c0_7 = arith.constant 0 : index
    %10 = vector.load %arg4[%c0_6, %c0_7] : memref<128x64xbf16, #tpu.memory_space<vmem>>, vector<128x64xbf16>
    %cst_8 = arith.constant dense<0.000000e+00> : vector<8x64xf32>
    %11 = tpu.matmul %9, %10, %cst_8 {dimension_numbers = #tpu.dot_dimension_numbers<[1], [0], [0], [1], [0, 0, 1, 1], [], []>} : vector<8x128xbf16>, vector<128x64xbf16>, vector<8x64xf32> -> vector<8x64xf32>
    %c0_9 = arith.constant 0 : index
    %c0_10 = arith.constant 0 : index
    %12 = vector.load %arg5[%c0_9, %c0_10] : memref<1x64xf32, #tpu.memory_space<vmem>>, vector<1x64xf32>
    %13 = vector.broadcast %12 : vector<1x64xf32> to vector<8x64xf32>
    %14 = arith.addf %11, %13 : vector<8x64xf32>
    %cst_11 = arith.constant 0.000000e+00 : f32
    %15 = vector.broadcast %cst_11 : f32 to vector<8x64xf32>
    %16 = arith.maximumf %14, %15 : vector<8x64xf32>
    %17 = arith.truncf %16 : vector<8x64xf32> to vector<8x64xbf16>
    %c0_12 = arith.constant 0 : index
    %c0_13 = arith.constant 0 : index
    %18 = vector.load %arg6[%c0_12, %c0_13] : memref<64x128xbf16, #tpu.memory_space<vmem>>, vector<64x128xbf16>
    %cst_14 = arith.constant dense<0.000000e+00> : vector<8x128xf32>
    %19 = tpu.matmul %17, %18, %cst_14 {dimension_numbers = #tpu.dot_dimension_numbers<[1], [0], [0], [1], [0, 0, 1, 1], [], []>} : vector<8x64xbf16>, vector<64x128xbf16>, vector<8x128xf32> -> vector<8x128xf32>
    %c0_15 = arith.constant 0 : index
    %c0_16 = arith.constant 0 : index
    %20 = vector.load %arg7[%c0_15, %c0_16] : memref<1x128xf32, #tpu.memory_space<vmem>>, vector<1x128xf32>
    %21 = vector.broadcast %20 : vector<1x128xf32> to vector<8x128xf32>
    %22 = arith.addf %19, %21 : vector<8x128xf32>
    %23 = vector.extract_strided_slice %22 {offsets = [0, 0], sizes = [8, 4], strides = [1, 1]} : vector<8x128xf32> to vector<8x4xf32>
    %24 = arith.negf %23 : vector<8x4xf32>
    %25 = math.exp %24 : vector<8x4xf32>
    %cst_17 = arith.constant 1.000000e+00 : f32
    %26 = vector.broadcast %cst_17 : f32 to vector<8x4xf32>
    %27 = arith.addf %26, %25 : vector<8x4xf32>
    %28 = arith.divf %26, %27 : vector<8x4xf32>
    %c0_18 = arith.constant 0 : index
    %c0_19 = arith.constant 0 : index
    %29 = vector.load %arg8[%c0_18, %c0_19] : memref<8x4xf32, #tpu.memory_space<vmem>>, vector<8x4xf32>
    tpu.vector_store %arg8[%c0_18, %c0_19], %28 {strides = array<i32>} : memref<8x4xf32, #tpu.memory_space<vmem>>, vector<8x4xf32>,
    return
  }
  func.func @transform_0(%arg0: i32) -> (i32, i32) {
    %c0_i32 = arith.constant 0 : i32
    %c0_i32_0 = arith.constant 0 : i32
    return %arg0, %c0_i32 : i32, i32
  }
  func.func @transform_1(%arg0: i32) -> (i32, i32) {
    %c0_i32 = arith.constant 0 : i32
    %c0_i32_0 = arith.constant 0 : i32
    %c0_i32_1 = arith.constant 0 : i32
    return %c0_i32, %c0_i32_0 : i32, i32
  }
  func.func @transform_2(%arg0: i32) -> (i32, i32) {
    %c0_i32 = arith.constant 0 : i32
    %c0_i32_0 = arith.constant 0 : i32
    %c0_i32_1 = arith.constant 0 : i32
    return %c0_i32, %c0_i32_0 : i32, i32
  }
  func.func @transform_3(%arg0: i32) -> (i32, i32) {
    %c0_i32 = arith.constant 0 : i32
    %c0_i32_0 = arith.constant 0 : i32
    %c0_i32_1 = arith.constant 0 : i32
    return %c0_i32, %c0_i32_0 : i32, i32
  }
  func.func @transform_4(%arg0: i32) -> (i32, i32) {
    %c0_i32 = arith.constant 0 : i32
    %c0_i32_0 = arith.constant 0 : i32
    %c0_i32_1 = arith.constant 0 : i32
    return %c0_i32, %c0_i32_0 : i32, i32
  }
  func.func @transform_5(%arg0: i32) -> (i32, i32) {
    %c0_i32 = arith.constant 0 : i32
    %c0_i32_0 = arith.constant 0 : i32
    %c0_i32_1 = arith.constant 0 : i32
    return %c0_i32, %c0_i32_0 : i32, i32
  }
  func.func @transform_6(%arg0: i32) -> (i32, i32) {
    %c0_i32 = arith.constant 0 : i32
    %c0_i32_0 = arith.constant 0 : i32
    %c0_i32_1 = arith.constant 0 : i32
    return %c0_i32, %c0_i32_0 : i32, i32
  }
  func.func @transform_7(%arg0: i32) -> (i32, i32) {
    %c0_i32 = arith.constant 0 : i32
    %c0_i32_0 = arith.constant 0 : i32
    return %arg0, %c0_i32 : i32, i32
  }
}

</mosaic_0001>

<bundles_post_ra>
// kernel: tpu_custom_call.1
= control target key start
LH: loop header
LB: loop body
LE: loop exit
PB: predicated region body
PF: predicated region fallthrough
CT: control target
= control target key end

     0   :  { %s767_s24 = smov 0   ;;  %s845_s0 = inlined_call_operand.vmem [shape: f32[16,32], index: 0, kind: input, shape index: {}]   ;;  %s846_s1 = inlined_call_operand.vmem [shape: bf16[32,128], index: 1, kind: input, shape index: {}]   ;;  %s847_s2 = inlined_call_operand.vmem [shape: f32[1,128], index: 2, kind: input, shape index: {}]   ;;  %s848_s3 = inlined_call_operand.vmem [shape: bf16[128,64], index: 3, kind: input, shape index: {}]   ;;  %s849_s4 = inlined_call_operand.vmem [shape: f32[1,64], index: 4, kind: input, shape index: {}]   ;;  %s850_s5 = inlined_call_operand.vmem [shape: bf16[64,128], index: 5, kind: input, shape index: {}]   ;;  %s851_s6 = inlined_call_operand.vmem [shape: f32[1,128], index: 6, kind: input, shape index: {}]   ;;  %s852_s7 = inlined_call_operand.vmem [shape: f32[16,4], index: 7, kind: output, shape index: {}]  }
   0x1 LB: > { %s603_s25 = sadd.s32 4294967295, %s723_s24   ;;  %p607_p0 = scmp.ge.s32.totalorder %s723_s24, 1  ;;  %s723_s24 = sphi %s767_s24, %s17_s24  }
   0x2   : > { %p236_p1 = scmp.lt.s32.totalorder %s723_s24, 3 }
   0x4   : > { %p237_p2 = pnand %p607_p0, %p236_p1 }
   0x5   : > { %v699_v0 = vld [vmem:[%s846_s1] sm:$0xff] (!%p237_p2)   ;;  %v725_v1 = vmov (!%p237_p2), 0.0   ;;  %v700_v2 = vld [vmem:[%s846_s1 + $0x8] sm:$0xff] (!%p237_p2)   ;;  %vm726_vm0 = vmmov (!%p237_p2), 0   ;;  %p266_p3 = scmp.lt.s32.totalorder (!%p237_p2), %s603_s25, 1  ;;  %vm300_vm1 = vcmask (!%p237_p2), 261120  }
   0x6   : > { %240 = sbr.rel (%p237_p2) target bundleno = 696 (0x2b8), region = 48  ;;  %649 = vmatprep.subr.bf16.mxu0 (!%p237_p2), %v725_v1  ;;  %657 = vmatprep.subr.bf16.mxu1 (!%p237_p2), %v725_v1  ;;  %v701_v3 = vld [vmem:[%s848_s3] sm:$0xff] (!%p237_p2)   ;;  %v702_v4 = vld [vmem:[%s848_s3 + $0x8] sm:$0xff] (!%p237_p2)   ;;  %v703_v6 = vld [vmem:[%s848_s3 + $0x10] sm:$0xff] (!%p237_p2)   ;;  %vm498_vm2 = vcmask (!%p237_p2), 523264   ;;  %vm548_vm3 = vcmask (!%p237_p2), 31744  }
   0x7   : > { %650 = vmatpush3.bf16.msra.mxu0 (!%p237_p2), %v699_v0  ;;  %653 = vmatprep.mubr.msk.bf16.mxu0 (!%p237_p2), %vm726_vm0, %v725_v1  ;;  %v704_v8 = vld [vmem:[%s848_s3 + $0x18] sm:$0xff] (!%p237_p2)   ;;  %v705_v9 = vld [vmem:[%s848_s3 + $0x20] sm:$0xff] (!%p237_p2)   ;;  %v706_v10 = vld [vmem:[%s848_s3 + $0x28] sm:$0xff] (!%p237_p2)  }
   0x8   : > { %651 = vmatprep.subr.bf16.mxu0 (!%p237_p2), %v725_v1  ;;  %673 = vmatprep.mubr.msk.bf16.mxu1 (!%p237_p2), %vm726_vm0, %v725_v1  ;;  %v707_v11 = vld [vmem:[%s848_s3 + $0x30] sm:$0xff] (!%p237_p2)   ;;  %v708_v12 = vld [vmem:[%s848_s3 + $0x38] sm:$0xff] (!%p237_p2)   ;;  %v709_v13 = vld [vmem:[%s850_s5] sm:$0xff] (!%p237_p2)  }
   0x9   : > { %658 = vmatpush3.bf16.msra.mxu1 (!%p237_p2), %v701_v3  ;;  %v710_v14 = vld [vmem:[%s850_s5 + $0x8] sm:$0xff] (!%p237_p2)   ;;  %v610_v15 = vld [vmem:[%s847_s2] ss:$0 sm:$0xff] (!%p237_p2)  ;;  %v711_v23 = vld [vmem:[%s850_s5 + $0x10] sm:$0xff] (!%p237_p2)  }
   0xa   : > { %659 = vmatprep.subr.bf16.mxu1 (!%p237_p2), %v725_v1  ;;  %v712_v24 = vld [vmem:[%s850_s5 + $0x18] sm:$0xff] (!%p237_p2)   ;;  %v614_v25 = vld [vmem:[%s849_s4] ss:$0 sm:$0xff] (!%p237_p2) }
   0xb   : > { %652 = vmatpush3.bf16.msra.mxu0 (!%p237_p2), %v700_v2  ;;  %v623_v33 = vld [vmem:[%s851_s6] ss:$0 sm:$0xff] (!%p237_p2) }
   0xc   : > { %677 = vmatprep.subr.bf16.mxu0 (!%p237_p2), %v725_v1 }
   0xd   : > { %s854_s25 = smov (!%p266_p3, %s603_s25), 1  ;;  %660 = vmatpush3.bf16.msra.mxu1 %v702_v4 }
   0xe   : > { %s608_s11 = sshll.u32 %s854_s25, 3  ;;  %661 = vmatprep.subr.bf16.mxu1 %v725_v1 }
   0xf   : > { %s269_s14 = scalar_lea.vmem %s845_s0, %s608_s11  ;;  %s273_s23 = scalar_lea.vmem %s852_s7, %s608_s11 }
  0x10   : > { %v275_v5 = vld [vmem:[%s269_s14] sm:$0xff] }
  0x11   : > { %v276_v7 = vpack.c.bf16 %v275_v5, %v275_v5  ;;  %662 = vmatpush3.bf16.msra.mxu1 %v703_v6 }
  0x12   : > { %663 = vmatprep.subr.bf16.mxu1 %v725_v1 }
  0x13   : > { %654 = vmatmul.mubr.msk.bf16.vlgmr.msra.gmra.mrb[0].mxu0 %vm300_vm1, %v276_v7 }
  0x14   : > { %685 = vmatprep.mubr.msk.bf16.mxu0 %vm726_vm0, %v725_v1  ;;  %678 = vmatpush3.bf16.msra.mxu0 %v709_v13 }
  0x15   : > { %664 = vmatpush3.bf16.msra.mxu1 %v704_v8  ;;  %679 = vmatprep.subr.bf16.mxu0 %v725_v1 }
  0x16   : > { %665 = vmatprep.subr.bf16.mxu1 %v725_v1 }
  0x18   : > { %680 = vmatpush3.bf16.msra.mxu0 %v710_v14 }
  0x19   : > { %666 = vmatpush3.bf16.msra.mxu1 %v705_v9  ;;  %681 = vmatprep.subr.bf16.mxu0 %v725_v1 }
  0x1a   : > { %667 = vmatprep.subr.bf16.mxu1 %v725_v1 }
  0x1c   : > { %682 = vmatpush3.bf16.msra.mxu0 %v711_v23 }
  0x1d   : > { %668 = vmatpush3.bf16.msra.mxu1 %v706_v10  ;;  %683 = vmatprep.subr.bf16.mxu0 %v725_v1 }
  0x1e   : > { %669 = vmatprep.subr.bf16.mxu1 %v725_v1 }
  0x20   : > { %684 = vmatpush3.bf16.msra.mxu0 %v712_v24 }
  0x21   : > { %670 = vmatpush3.bf16.msra.mxu1 %v707_v11 }
  0x22   : > { %671 = vmatprep.subr.bf16.mxu1 %v725_v1 }
  0x25   : > { %672 = vmatpush3.bf16.msra.mxu1 %v708_v12 }
  0xe6   : > { %v338_v16 = vpop.f32.mrb[0].mxu0 }
  0xe7   : > { %v339_v17 = vadd.f32 %v610_v15, %v338_v16  ;;  %v655_v18 = vpop.f32.mrb[1].mxu0 }
  0xe8   : > { %v341_v19 = vpop.f32.mrb[2].mxu0 }
  0xe9   : > { %v344_v20 = vmax.f32 %v339_v17, 0.0  ;;  %v656_v21 = vpop.f32.mrb[3].mxu0 }
  0xeb   : > { %v345_v22 = vpack.c.bf16 %v344_v20, %v344_v20 }
  0xed   : > { %674 = vmatmul.mubr.bf16.vlgmr.msra.gmra.mrb[0].mxu1 %v345_v22 }
 0x1c0   : > { %v451_v26 = vpop.f32.mrb[0].mxu1 }
 0x1c1   : > { %v452_v27 = vadd.f32 %v614_v25, %v451_v26  ;;  %v675_v28 = vpop.f32.mrb[1].mxu1 }
 0x1c2   : > { %v454_v29 = vpop.f32.mrb[2].mxu1 }
 0x1c3   : > { %v457_v30 = vmax.f32 %v452_v27, 0.0  ;;  %v676_v31 = vpop.f32.mrb[3].mxu1 }
 0x1c5   : > { %v458_v32 = vpack.c.bf16 %v457_v30, %v457_v30 }
 0x1c7   : > { %686 = vmatmul.mubr.msk.bf16.vlgmr.msra.gmra.mrb[4].mxu0 %vm498_vm2, %v458_v32 }
 0x29a   : > { %v536_v34 = vpop.f32.mrb[4].mxu0 }
 0x29b   : > { %v537_v35 = vadd.f32 %v623_v33, %v536_v34  ;;  %v687_v36 = vpop.f32.mrb[5].mxu0 }
 0x29c   : > { %v539_v37 = vpop.f32.mrb[6].mxu0 }
 0x29d   : > { %v629_v38 = vmul.f32 -1.442695, %v537_v35  ;;  %v688_v39 = vpop.f32.mrb[7].mxu0 }
 0x29f   : > { %713 = vpow2.f32 %v629_v38 }
 0x2a9   : > { %v714_v40 = vpop.eup %713 }
 0x2aa   : > { %v545_v41 = vadd.f32 1.0, %v714_v40 }
 0x2ac   : > { %715 = vrcp.f32 %v545_v41 }
 0x2b6   : > { %v716_v42 = vpop.eup %715 }
 0x2b7   : > { %549 = vst.msk [vmem:[%s273_s23] sm:$0xff] %vm548_vm3, %v716_v42 }
 0x2b8 PF: > { %s17_s24 = sadd.s32 1, %s723_s24  }
 0x2b9   : > { %p14_p4 = scmp.ge.s32.totalorder %s17_s24, 4  }
 0x2bb   :  { %16 = sbr.rel (!%p14_p4) target bundleno = 1 (0x1), region = 78 }

</bundles_post_ra>
